<compile_context>
chip_gen: v5e
topology: v5e:2x2
jax: 0.10.0
libtpu: 0.0.40
codegen_flags: <defaults>
</compile_context>

<pallas_src>
import functools

import jax
import jax.numpy as jnp
from jax.experimental import pallas as pl
from jax.experimental.pallas import tpu as pltpu


# ------------------------------ Pallas kernel --------------------------------

def _actor_critic_loss_kernel(beta_ref, policy_ref, side_ref, o_ref, acc_ref,
                              *, batch_size, tile_b, needs_mask):
    step = pl.program_id(0)

    @pl.when(step == 0)
    def _init():
        acc_ref[...] = jnp.zeros_like(acc_ref)

    beta = beta_ref[0]                                          # SMEM scalar

    # Upcast the policy tile in VMEM (input stays in its native dtype in HBM).
    logits = policy_ref[...].astype(jnp.float32)                # (tile_b, A)

    side = side_ref[...]                                        # (tile_b, 4)
    actions = side[:, 0:1].astype(jnp.int32)                    # (tile_b, 1)
    td = side[:, 1:2]
    value = side[:, 2:3]
    r = side[:, 3:4]

    # Numerically-stable softmax statistics with a SINGLE exp pass.
    m = jnp.max(logits, axis=1, keepdims=True)                  # (tile_b, 1)
    z = logits - m                                              # (tile_b, A)
    e = jnp.exp(z)                                              # (tile_b, A)
    s = jnp.sum(e, axis=1, keepdims=True)                       # (tile_b, 1)
    log_s = jnp.log(s)                                          # (tile_b, 1)

    # entropy = -sum(p * log_p) = log_s - sum(e*z)/s
    ez = jnp.sum(e * z, axis=1, keepdims=True)
    entropy = log_s - ez / s                                    # (tile_b, 1)

    # nll = -log_p[i, a] = log_s - z[i, a]; gather via lane-iota select.
    cols = jax.lax.broadcasted_iota(jnp.int32, z.shape, 1)      # (tile_b, A)
    z_a = jnp.sum(jnp.where(cols == actions, z, 0.0), axis=1, keepdims=True)
    nll = log_s - z_a                                           # (tile_b, 1)

    # Fused per-sample contribution: policy loss + value loss.
    diff = value - r
    contrib = nll * td - beta * entropy + 0.25 * diff * diff    # (tile_b, 1)

    if needs_mask:  # static: only emitted when B % tile_b != 0
        rows = step * tile_b + jax.lax.broadcasted_iota(
            jnp.int32, contrib.shape, 0)
        contrib = jnp.where(rows < batch_size, contrib, 0.0)

    acc_ref[...] += jnp.sum(contrib, axis=0, keepdims=True)     # (1, 1)

    @pl.when(step == pl.num_programs(0) - 1)
    def _finalize():
        o_ref[...] = acc_ref[...]


# --------------------------------- wrapper ------------------------------------

def _pick_tile_b(batch, num_actions):
    # Keep one policy tile <= ~4 MiB so 2x double-buffered tiles (+ side
    # inputs) fit comfortably in v5e's 16 MiB default scoped VMEM and v7x's
    # 64 MiB physical VMEM.
    bytes_per_row = max(num_actions * 4, 1)
    rows_budget = max(8, (4 * 1024 * 1024) // bytes_per_row)
    cap = max(8, min(1024, (rows_budget // 8) * 8))
    return batch if batch <= cap else cap


def actor_critic_loss(policy, value, action_taken, temporary_difference, r,
                      *, entropy_beta, tile_b=None):
    """Fused Actor-Critic loss. Returns a scalar jnp.float32."""
    b, a = policy.shape
    if tile_b is None:
        tile_b = _pick_tile_b(b, a)
    num_tiles = pl.cdiv(b, tile_b)
    needs_mask = (b % tile_b) != 0

    # Pack the four per-sample scalars into one (B, 4) f32 array -> one DMA.
    side = jnp.stack(
        [action_taken.astype(jnp.float32),
         temporary_difference.astype(jnp.float32),
         value.astype(jnp.float32),
         r.astype(jnp.float32)], axis=1)                        # (B, 4)
    beta = jnp.full((1,), entropy_beta, jnp.float32)

    out = pl.pallas_call(
        functools.partial(_actor_critic_loss_kernel,
                          batch_size=b, tile_b=tile_b, needs_mask=needs_mask),
        out_shape=jax.ShapeDtypeStruct((1, 1), jnp.float32),
        grid=(num_tiles,),
        in_specs=[
            pl.BlockSpec(memory_space=pltpu.MemorySpace.SMEM),       # beta
            pl.BlockSpec((tile_b, a), lambda i: (i, 0)),             # policy
            pl.BlockSpec((tile_b, 4), lambda i: (i, 0)),             # side
        ],
        out_specs=pl.BlockSpec((1, 1), lambda i: (0, 0)),
        scratch_shapes=[pltpu.VMEM((1, 1), jnp.float32)],
        compiler_params=pltpu.CompilerParams(
            dimension_semantics=("arbitrary",)),
    )(beta, policy, side)
    return out[0, 0]


# ------------------------------ JAX reference ---------------------------------

def _reference_loss(policy, value, action_taken, temporary_difference, r,
                    entropy_beta):
    policy = policy.astype(jnp.float32)
    log_p = jax.nn.log_softmax(policy, axis=1)
    p = jax.nn.softmax(policy, axis=1)
    entropy = -jnp.sum(p * log_p, axis=1)
    nll = -jnp.take_along_axis(log_p, action_taken[:, None], axis=1)[:, 0]
    policy_loss = jnp.sum(nll * temporary_difference - entropy * entropy_beta)
    value_loss = 0.25 * jnp.sum(jnp.square(value - r))
    return value_loss + policy_loss


# ---------------------------------- main --------------------------------------

if __name__ == "__main__":
    ENTROPY_BETA = 0.01

    def _run_case(key, b, a, tile_b=None):
        kp, ka, kt, kv, kr = jax.random.split(key, 5)
        policy = jax.random.normal(kp, (b, a), jnp.float32)
        action_taken = jax.random.randint(ka, (b,), 0, a, jnp.int32)
        td = jax.random.normal(kt, (b,), jnp.float32)
        value = jax.random.normal(kv, (b,), jnp.float32)
        r = jax.random.normal(kr, (b,), jnp.float32)

        loss_fn = jax.jit(functools.partial(actor_critic_loss,
                                            entropy_beta=ENTROPY_BETA,
                                            tile_b=tile_b))
        loss = loss_fn(policy, value, action_taken, td, r)
        jax.block_until_ready(loss)

        ref = _reference_loss(policy, value, action_taken, td, r, ENTROPY_BETA)
        assert loss.shape == ()
        assert bool(jnp.isfinite(loss))
        assert bool(jnp.allclose(loss, ref, rtol=1e-5, atol=1e-4)), (loss, ref)

    key = jax.random.PRNGKey(0)
    k1, k2 = jax.random.split(key)

    # Small shape consistent with the module (batch=8, 128 discrete actions).
    _run_case(k1, b=8, a=128)
    # Multi-tile case with a partial tail tile (exercises grid + row masking).
    _run_case(k2, b=40, a=64, tile_b=16)

    print("KERNEL_OK")
</pallas_src>

<mosaic_0001>
module attributes {stable_mosaic.version = 11 : i64} {
  func.func @_actor_critic_loss_kernel(%arg0: i32, %arg1: memref<1xf32, #tpu.memory_space<smem>>, %arg2: memref<8x128xf32, #tpu.memory_space<vmem>>, %arg3: memref<8x4xf32, #tpu.memory_space<vmem>>, %arg4: memref<1x1xf32, #tpu.memory_space<vmem>>, %arg5: memref<1x1xf32, #tpu.memory_space<vmem>>) attributes {dimension_semantics = [#tpu.dimension_semantics<arbitrary>], iteration_bounds = array<i64: 1>, scalar_prefetch = 0 : i64, scratch_operands = 1 : i64, tpu.core_type = #tpu.core_type<tc>, window_params = [{transform_indices = @transform_0, window_bounds = array<i64: 1>}, {transform_indices = @transform_1, window_bounds = array<i64: 8, 128>}, {transform_indices = @transform_2, window_bounds = array<i64: 8, 4>}, {pipeline_mode = #tpu.pipeline_mode<synchronous>, transform_indices = @transform_3, window_bounds = array<i64: 1, 1>}]} {
    %c0_i32 = arith.constant 0 : i32
    %0 = arith.cmpi eq, %arg0, %c0_i32 : i32
    %1 = arith.extui %0 : i1 to i32
    %c0_i32_0 = arith.constant 0 : i32
    %2 = arith.cmpi ne, %1, %c0_i32_0 : i32
    scf.if %2 {
      %cst_17 = arith.constant 0.000000e+00 : f32
      %49 = vector.broadcast %cst_17 : f32 to vector<1x1xf32>
      %c0_18 = arith.constant 0 : index
      %c0_19 = arith.constant 0 : index
      %50 = vector.load %arg5[%c0_18, %c0_19] : memref<1x1xf32, #tpu.memory_space<vmem>>, vector<1x1xf32>
      tpu.vector_store %arg5[%c0_18, %c0_19], %49 {strides = array<i32>} : memref<1x1xf32, #tpu.memory_space<vmem>>, vector<1x1xf32>,
    } else {
    }
    %c0 = arith.constant 0 : index
    %3 = memref.load %arg1[%c0] : memref<1xf32, #tpu.memory_space<smem>>
    %c0_1 = arith.constant 0 : index
    %c0_2 = arith.constant 0 : index
    %4 = vector.load %arg2[%c0_1, %c0_2] : memref<8x128xf32, #tpu.memory_space<vmem>>, vector<8x128xf32>
    %c0_3 = arith.constant 0 : index
    %c0_4 = arith.constant 0 : index
    %5 = vector.load %arg3[%c0_3, %c0_4] : memref<8x4xf32, #tpu.memory_space<vmem>>, vector<8x4xf32>
    %6 = vector.extract_strided_slice %5 {offsets = [0, 0], sizes = [8, 1], strides = [1, 1]} : vector<8x4xf32> to vector<8x1xf32>
    %7 = arith.fptosi %6 : vector<8x1xf32> to vector<8x1xi32>
    %8 = vector.extract_strided_slice %5 {offsets = [0, 1], sizes = [8, 1], strides = [1, 1]} : vector<8x4xf32> to vector<8x1xf32>
    %9 = vector.extract_strided_slice %5 {offsets = [0, 2], sizes = [8, 1], strides = [1, 1]} : vector<8x4xf32> to vector<8x1xf32>
    %10 = vector.extract_strided_slice %5 {offsets = [0, 3], sizes = [8, 1], strides = [1, 1]} : vector<8x4xf32> to vector<8x1xf32>
    %cst = arith.constant dense<0xFF800000> : vector<8xf32>
    %11 = vector.multi_reduction <maximumf>, %4, %cst [1] : vector<8x128xf32> to vector<8xf32>
    %12 = vector.shape_cast %11 : vector<8xf32> to vector<8x1xf32>
    %13 = vector.broadcast %12 : vector<8x1xf32> to vector<8x128xf32>
    %14 = arith.subf %4, %13 : vector<8x128xf32>
    %15 = math.exp %14 : vector<8x128xf32>
    %cst_5 = arith.constant dense<0.000000e+00> : vector<8xf32>
    %16 = vector.multi_reduction <add>, %15, %cst_5 [1] : vector<8x128xf32> to vector<8xf32>
    %17 = vector.shape_cast %16 : vector<8xf32> to vector<8x1xf32>
    %18 = math.log %17 : vector<8x1xf32>
    %19 = arith.mulf %15, %14 : vector<8x128xf32>
    %cst_6 = arith.constant dense<0.000000e+00> : vector<8xf32>
    %20 = vector.multi_reduction <add>, %19, %cst_6 [1] : vector<8x128xf32> to vector<8xf32>
    %21 = vector.shape_cast %20 : vector<8xf32> to vector<8x1xf32>
    %22 = arith.divf %21, %17 : vector<8x1xf32>
    %23 = arith.subf %18, %22 : vector<8x1xf32>
    %24 = tpu.iota {dimensions = array<i32: 1>} : vector<8x128xi32>
    %25 = vector.broadcast %7 : vector<8x1xi32> to vector<8x128xi32>
    %26 = arith.cmpi eq, %24, %25 : vector<8x128xi32>
    %cst_7 = arith.constant 0.000000e+00 : f32
    %27 = vector.broadcast %cst_7 : f32 to vector<8x128xf32>
    %28 = arith.select %26, %14, %27 : vector<8x128xi1>, vector<8x128xf32>
    %cst_8 = arith.constant dense<0.000000e+00> : vector<8xf32>
    %29 = vector.multi_reduction <add>, %28, %cst_8 [1] : vector<8x128xf32> to vector<8xf32>
    %30 = vector.shape_cast %29 : vector<8xf32> to vector<8x1xf32>
    %31 = arith.subf %18, %30 : vector<8x1xf32>
    %32 = arith.subf %9, %10 : vector<8x1xf32>
    %33 = arith.mulf %31, %8 : vector<8x1xf32>
    %34 = vector.broadcast %3 : f32 to vector<8x1xf32>
    %35 = arith.mulf %34, %23 : vector<8x1xf32>
    %36 = arith.subf %33, %35 : vector<8x1xf32>
    %cst_9 = arith.constant 2.500000e-01 : f32
    %37 = vector.broadcast %cst_9 : f32 to vector<8x1xf32>
    %38 = arith.mulf %37, %32 : vector<8x1xf32>
    %39 = arith.mulf %38, %32 : vector<8x1xf32>
    %40 = arith.addf %36, %39 : vector<8x1xf32>
    %c0_10 = arith.constant 0 : index
    %c0_11 = arith.constant 0 : index
    %41 = vector.load %arg5[%c0_10, %c0_11] : memref<1x1xf32, #tpu.memory_space<vmem>>, vector<1x1xf32>
    %cst_12 = arith.constant dense<0.000000e+00> : vector<1xf32>
    %42 = vector.multi_reduction <add>, %40, %cst_12 [0] : vector<8x1xf32> to vector<1xf32>
    %43 = vector.shape_cast %42 : vector<1xf32> to vector<1x1xf32>
    %44 = arith.addf %41, %43 : vector<1x1xf32>
    %c0_13 = arith.constant 0 : index
    %c0_14 = arith.constant 0 : index
    %45 = vector.load %arg5[%c0_13, %c0_14] : memref<1x1xf32, #tpu.memory_space<vmem>>, vector<1x1xf32>
    tpu.vector_store %arg5[%c0_13, %c0_14], %44 {strides = array<i32>} : memref<1x1xf32, #tpu.memory_space<vmem>>, vector<1x1xf32>,
    %c0_i32_15 = arith.constant 0 : i32
    %46 = arith.cmpi eq, %arg0, %c0_i32_15 : i32
    %47 = arith.extui %46 : i1 to i32
    %c0_i32_16 = arith.constant 0 : i32
    %48 = arith.cmpi ne, %47, %c0_i32_16 : i32
    scf.if %48 {
      %c0_17 = arith.constant 0 : index
      %c0_18 = arith.constant 0 : index
      %49 = vector.load %arg5[%c0_17, %c0_18] : memref<1x1xf32, #tpu.memory_space<vmem>>, vector<1x1xf32>
      %c0_19 = arith.constant 0 : index
      %c0_20 = arith.constant 0 : index
      %50 = vector.load %arg4[%c0_19, %c0_20] : memref<1x1xf32, #tpu.memory_space<vmem>>, vector<1x1xf32>
      tpu.vector_store %arg4[%c0_19, %c0_20], %49 {strides = array<i32>} : memref<1x1xf32, #tpu.memory_space<vmem>>, vector<1x1xf32>,
    } else {
    }
    return
  }
  func.func @transform_0(%arg0: i32) -> i32 {
    %c0_i32 = arith.constant 0 : i32
    %c0_i32_0 = arith.constant 0 : i32
    return %c0_i32 : i32
  }
  func.func @transform_1(%arg0: i32) -> (i32, i32) {
    %c0_i32 = arith.constant 0 : i32
    %c0_i32_0 = arith.constant 0 : i32
    return %arg0, %c0_i32 : i32, i32
  }
  func.func @transform_2(%arg0: i32) -> (i32, i32) {
    %c0_i32 = arith.constant 0 : i32
    %c0_i32_0 = arith.constant 0 : i32
    return %arg0, %c0_i32 : i32, i32
  }
  func.func @transform_3(%arg0: i32) -> (i32, i32) {
    %c0_i32 = arith.constant 0 : i32
    %c0_i32_0 = arith.constant 0 : i32
    %c0_i32_1 = arith.constant 0 : i32
    return %c0_i32, %c0_i32_0 : i32, i32
  }
}

</mosaic_0001>

<bundles_post_ra>
// kernel: actor_critic_loss.1
= control target key start
LH: loop header
LB: loop body
LE: loop exit
PB: predicated region body
PF: predicated region fallthrough
CT: control target
= control target key end

     0   :  { %s198_s0 = inlined_call_operand.<no memory space> [shape: f32[1], index: 0, kind: input, shape index: {}]   ;;  %s199_s1 = inlined_call_operand.vmem [shape: f32[8,128], index: 1, kind: input, shape index: {}]   ;;  %s200_s2 = inlined_call_operand.vmem [shape: f32[8,4], index: 2, kind: input, shape index: {}]   ;;  %s201_s3 = inlined_call_operand.hbm [shape: f32[1,1], index: 3, kind: output, shape index: {}]  }
   0x1   :  { %v23_v0 = vld [vmem:[%s199_s1] sm:$0xff] }
   0x2   :  { %v24_v1 = vld [vmem:[%s200_s2] sm:$0xff] }
   0x3   :  { %9 = vsyncpa [#allocation5], 0  ;;  %26 = vmax.xlane.f32.xlu0 %v23_v0  ;;  %s159_s16 = smov 127   ;;  %v160_v2 = vmov 0   ;;  %v118_v3 = vceil.f32 %v24_v1  ;;  %v119_v4 = vfloor.f32 %v24_v1  ;;  %vm117_vm0 = vcmp.lt.s32.totalorder %v24_v1, 0  ;;  %s108_s20 = sshll.u32 %s201_s3, 4  ;;  %s109_s20 = int_to_ptr.hbm [resolvable:$true] %s108_s20 }
   0x4   :  { %65 = vrot.lane.b32.xlu1 %v24_v1, %s159_s16  ;;  %126 = vset.pattern.permute.xlu0 %v160_v2  ;;  %v54_v11 = vlaneseq  ;;  %v70_v37 = vstv %s198_s0  ;;  %vm81_vm6 = vcmask 15368   ;;  %vm20_vm7 = vcmask 0   ;;  %s162_s0 = smov [#allocation4]  }
   0x5   :  { %v120_v5 = vsel %vm117_vm0, %v118_v3, %v119_v4  ;;  %v161_v51 = vmov 0.0   ;;  %s106_s17 = sshll.u32 %s162_s0, 4  ;;  %s107_s17 = int_to_ptr.vmem [resolvable:$true] %s106_s17 }
   0x6   :  { %v121_v6 = vcvt.f32.s32 %v120_v5  ;;  %v55_v12 = vand.u32 127, %v54_v11  ;;  %21 = vst.msk [vmem:[#allocation2] sm:$0x1] %vm20_vm7, %v161_v51 }
   0xd   :  { %v80_v52 = vld [vmem:[#allocation2] sm:$0x1] }
  0x17   :  { %57 = vperm.xlu0 %126, %v121_v6  }
  0x76   :  { %v27_v7 = vpop.xlane.xlu0 %26  ;;  %v66_v16 = vpop.permute.xlu1 %65 }
  0x77   :  { %v28_v8 = vsub.f32 %v23_v0, %v27_v7  ;;  %v68_v17 = vsub.f32 %v24_v1, %v66_v16 }
  0x79   :  { %v29_v9 = vmul.f32 1.442695, %v28_v8  ;;  %v73_v18 = vmul.f32 0.25, %v68_v17 }
  0x7b   :  { %127 = vpow2.f32 %v29_v9  ;;  %v74_v19 = vmul.f32 %v73_v18, %v68_v17 }
  0x81   :  { %v128_v10 = vpop.eup %127 }
  0x82   :  { %31 = vadd.xlane.f32.xlu1 %v128_v10  ;;  %v35_v15 = vmul.f32 %v128_v10, %v28_v8 }
  0x89   :  { %v58_v13 = vpop.permute.xlu0 %57 }
  0x8a   :  { %vm59_vm1 = vcmp.eq.s32.totalorder %v55_v12, %v58_v13 }
  0x8b   :  { %v60_v14 = vsel %vm59_vm1, %v28_v8, 0.0 }
  0x8c   :  { %61 = vadd.xlane.f32.xlu2 %v60_v14 }
  0x94   :  { %36 = vadd.xlane.f32.xlu2 %v35_v15 }
  0xac   :  { %76 = vrot.lane.b32.xlu2 %v74_v19, %s159_s16 }
  0xf5   :  { %v32_v20 = vpop.xlane.xlu1 %31 }
  0xf6   :  { %129 = vrcp.f32 %v32_v20  ;;  %v49_v25 = vand.u32 2147483648, %v32_v20  ;;  %v47_v28 = vand.u32 2147483647, %v32_v20  ;;  %vm43_vm3 = vweird.f32 %v32_v20 }
  0xf7   :  { %131 = vlog2.f32 %v32_v20 }
  0xf8   :  { %v50_v31 = vor.u32 1.1754944e-38, %v49_v25  ;;  %vm48_vm5 = vcmp.eq.f32.partialorder %v47_v28, 8.507059e+37 }
  0xfc   :  { %v130_v21 = vpop.eup %129 }
  0xfd   :  { %v39_v22 = vmul.f32 %v130_v21, %v32_v20  ;;  %v132_v26 = vpop.eup %131  ;;  %vm44_vm2 = vweird.f32 %v130_v21 }
  0xfe   :  { %v34_v30 = vmul.f32 0.6931472, %v132_v26  ;;  %vm45_vm4 = vmor %vm43_vm3, %vm44_vm2 }
  0xff   :  { %v40_v23 = vsub.f32 1.0, %v39_v22  ;;  %v62_v24 = vpop.xlane.xlu2 %61 }
 0x100   :  { %v63_v35 = vsub.f32 %v34_v30, %v62_v24 }
 0x101   :  { %v41_v27 = vmul.f32 %v130_v21, %v40_v23 }
 0x102   :  { %v69_v39 = vmul.f32 %v63_v35, %v24_v1 }
 0x103   :  { %v42_v29 = vadd.f32 %v130_v21, %v41_v27 }
 0x105   :  { %v46_v32 = vsel %vm45_vm4, %v130_v21, %v42_v29 }
 0x106   :  { %v51_v33 = vsel %vm48_vm5, %v50_v31, %v46_v32 }
 0x107   :  { %v37_v34 = vpop.xlane.xlu2 %36 }
 0x108   :  { %v52_v36 = vmul.f32 %v51_v33, %v37_v34 }
 0x10a   :  { %v53_v38 = vsub.f32 %v34_v30, %v52_v36 }
 0x10c   :  { %v71_v40 = vmul.f32 %v70_v37, %v53_v38 }
 0x10e   :  { %v72_v41 = vsub.f32 %v69_v39, %v71_v40 }
 0x10f   :  { %v77_v42 = vpop.permute.xlu2 %76 }
 0x110   :  { %v79_v43 = vadd.f32 %v77_v42, %v72_v41 }
 0x112   :  { %v82_v44 = vsel %vm81_vm6, %v79_v43, 0.0 }
 0x113   :  { %v83_v45 = vrot.slane %v82_v44, 4 }
 0x115   :  { %v84_v46 = vadd.f32 %v83_v45, %v82_v44 }
 0x117   :  { %v85_v47 = vrot.slane %v84_v46, 2 }
 0x119   :  { %v86_v48 = vadd.f32 %v85_v47, %v84_v46 }
 0x11b   :  { %v87_v49 = vrot.slane %v86_v48, 1 }
 0x11d   :  { %v88_v50 = vadd.f32 %v87_v49, %v86_v48 }
 0x11f   :  { %90 = vrot.lane.b32.xlu2 %v88_v50, %s159_s16 }
 0x179   :  { %v91_v53 = vpop.permute.xlu2 %90 }
 0x17a   :  { %v93_v54 = vadd.f32 %v91_v53, %v80_v52 }
 0x17c   :  { %95 = vst.msk [vmem:[#allocation2] sm:$0x1] %vm20_vm7, %v93_v54 }
 0x183   :  { %v99_v55 = vld [vmem:[#allocation2] sm:$0x1] }
 0x184   :  { %100 = vst.msk [vmem:[#allocation4] sm:$0x1] %vm20_vm7, %v99_v55 }
 0x185   :  { %111 = dma.vmem_to_hbm [thread:$0]  %s107_s17, 16, %s109_s20, [#allocation5]  }
 0x186   :  { %157 = dma.done.wait [#allocation5], 16  }
 0x187   :  { %158 = vsyncadd [#allocation5], 4294967280 }
 0x188   :  { %116 = vsyncpa [#allocation5], 1 }

</bundles_post_ra>
